<compile_context>
chip_gen: v6e
topology: v6e:2x2x1
jax: 0.10.0
libtpu: 0.0.40
codegen_flags: <defaults>
</compile_context>

<pallas_src>
import functools

import jax
import jax.numpy as jnp
from jax import lax
from jax.experimental import pallas as pl
from jax.experimental.pallas import tpu as pltpu

LANES = 128
ACC_ROWS = 32          # accumulator sublane depth (>=32 independent add chains)
MAX_TILE_ROWS = 4096   # (4096, 128) f32 block = 2 MiB per input per buffer


def _round_up(a, b):
    return -(-a // b) * b


def _make_sums_kernel(n_valid, tile_rows, acc_rows, steps_per_core, needs_guard):
    """Kernel accumulating [sum(bce), sum(sig), sum(t), sum(sig*t)] partials."""
    fold = tile_rows // acc_rows
    tile_elems = tile_rows * LANES

    def kernel(x_ref, t_ref, out_ref):
        core = pl.program_id(0)
        step = pl.program_id(1)

        @pl.when(step == 0)
        def _init():
            out_ref[...] = jnp.zeros_like(out_ref)

        x = x_ref[...].astype(jnp.float32)
        t = t_ref[...].astype(jnp.float32)

        # Shared transcendental: z = exp(-|x|)
        #   bce     = max(x, 0) - x*t + log1p(z)        (numerically stable)
        #   sigmoid = where(x >= 0, 1, z) / (1 + z)
        z = jnp.exp(-jnp.abs(x))
        bce = jnp.maximum(x, 0.0) - x * t + jnp.log1p(z)
        sig = jnp.where(x >= 0.0, 1.0, z) / (1.0 + z)
        inter = sig * t

        def accumulate(c_bce, c_sig, c_tgt, c_int):
            # Per-step sublane fold into the small resident accumulator:
            # pure VPU vreg adds; no full-tile VMEM read-modify-write stream.
            # acc_rows is a multiple of 8 (or the full row count), so the
            # reshape never crosses an (8,128) tile boundary.
            def fold_sum(c):
                return jnp.sum(c.reshape(fold, acc_rows, LANES), axis=0)

            out_ref[0] += fold_sum(c_bce)
            out_ref[1] += fold_sum(c_sig)
            out_ref[2] += fold_sum(c_tgt)
            out_ref[3] += fold_sum(c_int)

        if needs_guard:
            # Only tail blocks (lane padding, partial boundary block, or the
            # clamped duplicate block when the block count is odd) pay for the
            # validity mask; every other step runs the unmasked fast path.
            lin = core * steps_per_core + step
            base = lin * tile_elems
            is_tail = (base + tile_elems) > n_valid

            @pl.when(jnp.logical_not(is_tail))
            def _full_block():
                accumulate(bce, sig, t, inter)

            @pl.when(is_tail)
            def _tail_block():
                # `where` (not multiply) so garbage in the padded region of a
                # boundary block can never leak NaN/Inf into the sums.
                row = lax.broadcasted_iota(jnp.int32, (tile_rows, LANES), 0)
                col = lax.broadcasted_iota(jnp.int32, (tile_rows, LANES), 1)
                valid = (base + row * LANES + col) < n_valid
                zero = jnp.float32(0.0)
                accumulate(jnp.where(valid, bce, zero),
                           jnp.where(valid, sig, zero),
                           jnp.where(valid, t, zero),
                           jnp.where(valid, inter, zero))
        else:
            accumulate(bce, sig, t, inter)

    return kernel


@functools.partial(jax.jit, static_argnames=("alpha", "beta", "smooth"))
def neloss(y_hat, y, alpha=0.5, beta=0.5, smooth=1.0):
    """NELoss.forward: alpha * FocalLoss(y_hat, y) + beta * DiceLoss(y_hat, y)."""
    # Flatten exactly like .view(-1); no cast here (cast happens in-kernel so
    # bf16/f16 inputs are DMA'd at their native width).
    x_flat = y_hat.reshape(-1)
    t_flat = y.reshape(-1)
    n = x_flat.shape[0]

    # Pad only if needed to make the (rows, 128) view possible (<= 127 elems).
    n_rows = -(-n // LANES)
    n_lane_padded = n_rows * LANES
    if n_lane_padded != n:
        x_flat = jnp.pad(x_flat, (0, n_lane_padded - n))
        t_flat = jnp.pad(t_flat, (0, n_lane_padded - n))

    # Tile selection.
    if n_rows <= ACC_ROWS:
        tile_rows = n_rows          # single tiny block == whole array
        acc_rows = n_rows
    else:
        # Split the rows roughly in half so the size-2 "parallel" axis can
        # feed both TensorCores on v7x, then cap at MAX_TILE_ROWS.  Always a
        # multiple of ACC_ROWS so the in-kernel fold reshape is exact.
        half_rows = -(-n_rows // 2)
        tile_rows = min(MAX_TILE_ROWS, _round_up(half_rows, ACC_ROWS))
        acc_rows = ACC_ROWS

    total_blocks = -(-n_rows // tile_rows)
    steps_per_core = -(-total_blocks // 2)
    covered = 2 * steps_per_core * tile_rows * LANES
    needs_guard = covered > n       # lane pad / partial block / duplicate block

    x2d = x_flat.reshape(n_rows, LANES)
    t2d = t_flat.reshape(n_rows, LANES)

    def in_map(c, i):
        # Clamp so the duplicated out-of-range block (odd total_blocks) still
        # DMAs valid data; its contribution is masked to zero in-kernel.
        return (jnp.minimum(c * steps_per_core + i, total_blocks - 1), 0)

    tile_spec = pl.BlockSpec((tile_rows, LANES), in_map)
    out_spec = pl.BlockSpec((None, 4, acc_rows, LANES), lambda c, i: (c, 0, 0, 0))

    kernel = _make_sums_kernel(n, tile_rows, acc_rows, steps_per_core, needs_guard)

    partials = pl.pallas_call(
        kernel,
        out_shape=jax.ShapeDtypeStruct((2, 4, acc_rows, LANES), jnp.float32),
        grid_spec=pltpu.PrefetchScalarGridSpec(
            num_scalar_prefetch=0,
            grid=(2, steps_per_core),
            in_specs=[tile_spec, tile_spec],
            out_specs=out_spec,
        ),
        compiler_params=pltpu.CompilerParams(
            dimension_semantics=("parallel", "arbitrary"),
        ),
    )(x2d, t2d)

    # Tiny (2, 4, acc_rows, 128) partial-sum reduction + scalar glue in JAX.
    sums = jnp.sum(partials, axis=(0, 2, 3))
    bce_sum, sig_sum, tgt_sum, inter_sum = sums[0], sums[1], sums[2], sums[3]

    # FocalLoss (alpha=1, gamma=2) on the mean BCE-with-logits.
    bce_mean = bce_sum / n
    focal = (1.0 - jnp.exp(-bce_mean)) ** 2 * bce_mean

    # DiceLoss on sigmoid probabilities.
    dice = (2.0 * inter_sum + smooth) / (sig_sum + tgt_sum + smooth + 1e-9)

    return alpha * focal + beta * (1.0 - dice)


def _reference_neloss(y_hat, y, alpha, beta, smooth=1.0):
    """Pure-JAX reference mirroring the PyTorch module exactly."""
    x = y_hat.reshape(-1).astype(jnp.float32)
    t = y.reshape(-1).astype(jnp.float32)
    bce = jnp.mean(jnp.maximum(x, 0.0) - x * t + jnp.log1p(jnp.exp(-jnp.abs(x))))
    focal = (1.0 - jnp.exp(-bce)) ** 2 * bce
    s = jax.nn.sigmoid(x)
    inter = jnp.sum(s * t)
    dice = (2.0 * inter + smooth) / (jnp.sum(s) + jnp.sum(t) + smooth + 1e-9)
    return alpha * focal + beta * (1.0 - dice)


if __name__ == "__main__":
    key = jax.random.PRNGKey(0)
    alpha, beta = 0.7, 0.3

    # Primary small example consistent with the module (NCHW logit map).
    k1, k2 = jax.random.split(key)
    y_hat = jax.random.normal(k1, (2, 4, 16, 16), dtype=jnp.float32)
    y = jax.random.bernoulli(k2, 0.4, (2, 4, 16, 16)).astype(jnp.float32)
    loss = neloss(y_hat, y, alpha=alpha, beta=beta)
    jax.block_until_ready(loss)
    ref = _reference_neloss(y_hat, y, alpha, beta)
    assert jnp.allclose(loss, ref, rtol=1e-5, atol=1e-5), (loss, ref)

    # Medium case: two blocks (one per core on v7x) with a partial tail block.
    k3, k4 = jax.random.split(k1)
    y_hat2 = jax.random.normal(k3, (4, 8, 64, 66), dtype=jnp.float32)
    y2 = jax.random.bernoulli(k4, 0.3, (4, 8, 64, 66)).astype(jnp.float32)
    loss2 = neloss(y_hat2, y2, alpha=alpha, beta=beta)
    jax.block_until_ready(loss2)
    ref2 = _reference_neloss(y_hat2, y2, alpha, beta)
    assert jnp.allclose(loss2, ref2, rtol=1e-4, atol=1e-4), (loss2, ref2)

    # Ragged case (element count not a multiple of 128) -> lane-pad + mask.
    k5, k6 = jax.random.split(k2)
    y_hat3 = jax.random.normal(k5, (3, 5, 7, 11), dtype=jnp.float32)
    y3 = jax.random.bernoulli(k6, 0.5, (3, 5, 7, 11)).astype(jnp.float32)
    loss3 = neloss(y_hat3, y3, alpha=alpha, beta=beta)
    jax.block_until_ready(loss3)
    ref3 = _reference_neloss(y_hat3, y3, alpha, beta)
    assert jnp.allclose(loss3, ref3, rtol=1e-4, atol=1e-4), (loss3, ref3)

    # Larger case: multi-step accumulation per core, odd block count
    # (clamped duplicate block) and a partial boundary block.
    k7, k8 = jax.random.split(k3)
    y_hat4 = jax.random.normal(k7, (4, 8, 182, 182), dtype=jnp.float32)
    y4 = jax.random.bernoulli(k8, 0.35, (4, 8, 182, 182)).astype(jnp.float32)
    loss4 = neloss(y_hat4, y4, alpha=alpha, beta=beta)
    jax.block_until_ready(loss4)
    ref4 = _reference_neloss(y_hat4, y4, alpha, beta)
    assert jnp.allclose(loss4, ref4, rtol=1e-4, atol=1e-4), (loss4, ref4)

    print("KERNEL_OK")
</pallas_src>

<mosaic_0001>
module attributes {stable_mosaic.version = 11 : i64} {
  func.func @kernel(%arg0: i32, %arg1: i32, %arg2: memref<16x128xf32, #tpu.memory_space<vmem>>, %arg3: memref<16x128xf32, #tpu.memory_space<vmem>>, %arg4: memref<1x4x16x128xf32, #tpu.memory_space<vmem>>) attributes {dimension_semantics = [#tpu.dimension_semantics<parallel>, #tpu.dimension_semantics<arbitrary>], iteration_bounds = array<i64: 2, 1>, scalar_prefetch = 0 : i64, scratch_operands = 0 : i64, tpu.core_type = #tpu.core_type<tc>, window_params = [{transform_indices = @transform_0, window_bounds = array<i64: 16, 128>}, {transform_indices = @transform_1, window_bounds = array<i64: 16, 128>}, {transform_indices = @transform_2, window_bounds = array<i64: 1, 4, 16, 128>}]} {
    %c0_i32 = arith.constant 0 : i32
    %0 = arith.cmpi eq, %arg1, %c0_i32 : i32
    %1 = arith.extui %0 : i1 to i32
    %c0_i32_0 = arith.constant 0 : i32
    %2 = arith.cmpi ne, %1, %c0_i32_0 : i32
    scf.if %2 {
      %cst_12 = arith.constant 0.000000e+00 : f32
      %33 = vector.broadcast %cst_12 : f32 to vector<4x16x128xf32>
      %c0_13 = arith.constant 0 : index
      %c0_14 = arith.constant 0 : index
      %c0_15 = arith.constant 0 : index
      %c0_16 = arith.constant 0 : index
      %34 = vector.load %arg4[%c0_13, %c0_14, %c0_15, %c0_16] : memref<1x4x16x128xf32, #tpu.memory_space<vmem>>, vector<1x4x16x128xf32>
      %35 = vector.shape_cast %34 : vector<1x4x16x128xf32> to vector<4x16x128xf32>
      %36 = vector.shape_cast %33 : vector<4x16x128xf32> to vector<1x4x16x128xf32>
      tpu.vector_store %arg4[%c0_13, %c0_14, %c0_15, %c0_16], %36 {strides = array<i32>} : memref<1x4x16x128xf32, #tpu.memory_space<vmem>>, vector<1x4x16x128xf32>,
    } else {
    }
    %c0 = arith.constant 0 : index
    %c0_1 = arith.constant 0 : index
    %3 = vector.load %arg2[%c0, %c0_1] : memref<16x128xf32, #tpu.memory_space<vmem>>, vector<16x128xf32>
    %c0_2 = arith.constant 0 : index
    %c0_3 = arith.constant 0 : index
    %4 = vector.load %arg3[%c0_2, %c0_3] : memref<16x128xf32, #tpu.memory_space<vmem>>, vector<16x128xf32>
    %5 = math.absf %3 : vector<16x128xf32>
    %cst = arith.constant 0.000000e+00 : f32
    %6 = vector.broadcast %cst : f32 to vector<16x128xf32>
    %7 = arith.subf %6, %5 : vector<16x128xf32>
    %8 = math.exp %7 : vector<16x128xf32>
    %cst_4 = arith.constant 0.000000e+00 : f32
    %9 = vector.broadcast %cst_4 : f32 to vector<16x128xf32>
    %10 = arith.maximumf %3, %9 : vector<16x128xf32>
    %11 = arith.mulf %3, %4 : vector<16x128xf32>
    %12 = arith.subf %10, %11 : vector<16x128xf32>
    %13 = math.log1p %8 : vector<16x128xf32>
    %14 = arith.addf %12, %13 : vector<16x128xf32>
    %cst_5 = arith.constant 0.000000e+00 : f32
    %15 = vector.broadcast %cst_5 : f32 to vector<16x128xf32>
    %16 = arith.cmpf oge, %3, %15 : vector<16x128xf32>
    %cst_6 = arith.constant 1.000000e+00 : f32
    %17 = vector.broadcast %cst_6 : f32 to vector<16x128xf32>
    %18 = arith.select %16, %17, %8 : vector<16x128xi1>, vector<16x128xf32>
    %cst_7 = arith.constant 1.000000e+00 : f32
    %19 = vector.broadcast %cst_7 : f32 to vector<16x128xf32>
    %20 = arith.addf %19, %8 : vector<16x128xf32>
    %21 = arith.divf %18, %20 : vector<16x128xf32>
    %22 = arith.mulf %21, %4 : vector<16x128xf32>
    %c1_i32 = arith.constant 1 : i32
    %23 = arith.muli %arg0, %c1_i32 : i32
    %24 = arith.addi %23, %arg1 : i32
    %c2048_i32 = arith.constant 2048 : i32
    %25 = arith.muli %24, %c2048_i32 : i32
    %c2048_i32_8 = arith.constant 2048 : i32
    %26 = arith.addi %25, %c2048_i32_8 : i32
    %c2048_i32_9 = arith.constant 2048 : i32
    %27 = arith.cmpi sgt, %26, %c2048_i32_9 : i32
    %true = arith.constant true
    %28 = arith.xori %27, %true : i1
    %29 = arith.extui %28 : i1 to i32
    %c0_i32_10 = arith.constant 0 : i32
    %30 = arith.cmpi ne, %29, %c0_i32_10 : i32
    scf.if %30 {
      %c0_12 = arith.constant 0 : index
      %c0_13 = arith.constant 0 : index
      %c0_14 = arith.constant 0 : index
      %c0_15 = arith.constant 0 : index
      %33 = vector.load %arg4[%c0_12, %c0_13, %c0_14, %c0_15] : memref<1x4x16x128xf32, #tpu.memory_space<vmem>>, vector<1x1x16x128xf32>
      %34 = vector.shape_cast %33 : vector<1x1x16x128xf32> to vector<16x128xf32>
      %35 = vector.shape_cast %14 : vector<16x128xf32> to vector<1x16x128xf32>
      %cst_16 = arith.constant dense<0.000000e+00> : vector<16x128xf32>
      %36 = vector.multi_reduction <add>, %35, %cst_16 [0] : vector<1x16x128xf32> to vector<16x128xf32>
      %37 = arith.addf %34, %36 : vector<16x128xf32>
      %c0_17 = arith.constant 0 : index
      %c0_18 = arith.constant 0 : index
      %c0_19 = arith.constant 0 : index
      %c0_20 = arith.constant 0 : index
      %38 = vector.load %arg4[%c0_17, %c0_18, %c0_19, %c0_20] : memref<1x4x16x128xf32, #tpu.memory_space<vmem>>, vector<1x1x16x128xf32>
      %39 = vector.shape_cast %38 : vector<1x1x16x128xf32> to vector<16x128xf32>
      %40 = vector.shape_cast %37 : vector<16x128xf32> to vector<1x1x16x128xf32>
      tpu.vector_store %arg4[%c0_17, %c0_18, %c0_19, %c0_20], %40 {strides = array<i32>} : memref<1x4x16x128xf32, #tpu.memory_space<vmem>>, vector<1x1x16x128xf32>,
      %c0_21 = arith.constant 0 : index
      %c1 = arith.constant 1 : index
      %c0_22 = arith.constant 0 : index
      %c0_23 = arith.constant 0 : index
      %41 = vector.load %arg4[%c0_21, %c1, %c0_22, %c0_23] : memref<1x4x16x128xf32, #tpu.memory_space<vmem>>, vector<1x1x16x128xf32>
      %42 = vector.shape_cast %41 : vector<1x1x16x128xf32> to vector<16x128xf32>
      %43 = vector.shape_cast %21 : vector<16x128xf32> to vector<1x16x128xf32>
      %cst_24 = arith.constant dense<0.000000e+00> : vector<16x128xf32>
      %44 = vector.multi_reduction <add>, %43, %cst_24 [0] : vector<1x16x128xf32> to vector<16x128xf32>
      %45 = arith.addf %42, %44 : vector<16x128xf32>
      %c0_25 = arith.constant 0 : index
      %c1_26 = arith.constant 1 : index
      %c0_27 = arith.constant 0 : index
      %c0_28 = arith.constant 0 : index
      %46 = vector.load %arg4[%c0_25, %c1_26, %c0_27, %c0_28] : memref<1x4x16x128xf32, #tpu.memory_space<vmem>>, vector<1x1x16x128xf32>
      %47 = vector.shape_cast %46 : vector<1x1x16x128xf32> to vector<16x128xf32>
      %48 = vector.shape_cast %45 : vector<16x128xf32> to vector<1x1x16x128xf32>
      tpu.vector_store %arg4[%c0_25, %c1_26, %c0_27, %c0_28], %48 {strides = array<i32>} : memref<1x4x16x128xf32, #tpu.memory_space<vmem>>, vector<1x1x16x128xf32>,
      %c0_29 = arith.constant 0 : index
      %c2 = arith.constant 2 : index
      %c0_30 = arith.constant 0 : index
      %c0_31 = arith.constant 0 : index
      %49 = vector.load %arg4[%c0_29, %c2, %c0_30, %c0_31] : memref<1x4x16x128xf32, #tpu.memory_space<vmem>>, vector<1x1x16x128xf32>
      %50 = vector.shape_cast %49 : vector<1x1x16x128xf32> to vector<16x128xf32>
      %51 = vector.shape_cast %4 : vector<16x128xf32> to vector<1x16x128xf32>
      %cst_32 = arith.constant dense<0.000000e+00> : vector<16x128xf32>
      %52 = vector.multi_reduction <add>, %51, %cst_32 [0] : vector<1x16x128xf32> to vector<16x128xf32>
      %53 = arith.addf %50, %52 : vector<16x128xf32>
      %c0_33 = arith.constant 0 : index
      %c2_34 = arith.constant 2 : index
      %c0_35 = arith.constant 0 : index
      %c0_36 = arith.constant 0 : index
      %54 = vector.load %arg4[%c0_33, %c2_34, %c0_35, %c0_36] : memref<1x4x16x128xf32, #tpu.memory_space<vmem>>, vector<1x1x16x128xf32>
      %55 = vector.shape_cast %54 : vector<1x1x16x128xf32> to vector<16x128xf32>
      %56 = vector.shape_cast %53 : vector<16x128xf32> to vector<1x1x16x128xf32>
      tpu.vector_store %arg4[%c0_33, %c2_34, %c0_35, %c0_36], %56 {strides = array<i32>} : memref<1x4x16x128xf32, #tpu.memory_space<vmem>>, vector<1x1x16x128xf32>,
      %c0_37 = arith.constant 0 : index
      %c3 = arith.constant 3 : index
      %c0_38 = arith.constant 0 : index
      %c0_39 = arith.constant 0 : index
      %57 = vector.load %arg4[%c0_37, %c3, %c0_38, %c0_39] : memref<1x4x16x128xf32, #tpu.memory_space<vmem>>, vector<1x1x16x128xf32>
      %58 = vector.shape_cast %57 : vector<1x1x16x128xf32> to vector<16x128xf32>
      %59 = vector.shape_cast %22 : vector<16x128xf32> to vector<1x16x128xf32>
      %cst_40 = arith.constant dense<0.000000e+00> : vector<16x128xf32>
      %60 = vector.multi_reduction <add>, %59, %cst_40 [0] : vector<1x16x128xf32> to vector<16x128xf32>
      %61 = arith.addf %58, %60 : vector<16x128xf32>
      %c0_41 = arith.constant 0 : index
      %c3_42 = arith.constant 3 : index
      %c0_43 = arith.constant 0 : index
      %c0_44 = arith.constant 0 : index
      %62 = vector.load %arg4[%c0_41, %c3_42, %c0_43, %c0_44] : memref<1x4x16x128xf32, #tpu.memory_space<vmem>>, vector<1x1x16x128xf32>
      %63 = vector.shape_cast %62 : vector<1x1x16x128xf32> to vector<16x128xf32>
      %64 = vector.shape_cast %61 : vector<16x128xf32> to vector<1x1x16x128xf32>
      tpu.vector_store %arg4[%c0_41, %c3_42, %c0_43, %c0_44], %64 {strides = array<i32>} : memref<1x4x16x128xf32, #tpu.memory_space<vmem>>, vector<1x1x16x128xf32>,
    } else {
    }
    %31 = arith.extui %27 : i1 to i32
    %c0_i32_11 = arith.constant 0 : i32
    %32 = arith.cmpi ne, %31, %c0_i32_11 : i32
    scf.if %32 {
      %33 = tpu.iota {dimensions = array<i32: 0>} : vector<16x128xi32>
      %34 = tpu.iota {dimensions = array<i32: 1>} : vector<16x128xi32>
      %c128_i32 = arith.constant 128 : i32
      %35 = vector.broadcast %c128_i32 : i32 to vector<16x128xi32>
      %36 = arith.muli %33, %35 : vector<16x128xi32>
      %37 = vector.broadcast %25 : i32 to vector<16x128xi32>
      %38 = arith.addi %37, %36 : vector<16x128xi32>
      %39 = arith.addi %38, %34 : vector<16x128xi32>
      %c2048_i32_12 = arith.constant 2048 : i32
      %40 = vector.broadcast %c2048_i32_12 : i32 to vector<16x128xi32>
      %41 = arith.cmpi slt, %39, %40 : vector<16x128xi32>
      %cst_13 = arith.constant 0.000000e+00 : f32
      %42 = vector.broadcast %cst_13 : f32 to vector<16x128xf32>
      %43 = arith.select %41, %14, %42 : vector<16x128xi1>, vector<16x128xf32>
      %cst_14 = arith.constant 0.000000e+00 : f32
      %44 = vector.broadcast %cst_14 : f32 to vector<16x128xf32>
      %45 = arith.select %41, %21, %44 : vector<16x128xi1>, vector<16x128xf32>
      %cst_15 = arith.constant 0.000000e+00 : f32
      %46 = vector.broadcast %cst_15 : f32 to vector<16x128xf32>
      %47 = arith.select %41, %4, %46 : vector<16x128xi1>, vector<16x128xf32>
      %cst_16 = arith.constant 0.000000e+00 : f32
      %48 = vector.broadcast %cst_16 : f32 to vector<16x128xf32>
      %49 = arith.select %41, %22, %48 : vector<16x128xi1>, vector<16x128xf32>
      %c0_17 = arith.constant 0 : index
      %c0_18 = arith.constant 0 : index
      %c0_19 = arith.constant 0 : index
      %c0_20 = arith.constant 0 : index
      %50 = vector.load %arg4[%c0_17, %c0_18, %c0_19, %c0_20] : memref<1x4x16x128xf32, #tpu.memory_space<vmem>>, vector<1x1x16x128xf32>
      %51 = vector.shape_cast %50 : vector<1x1x16x128xf32> to vector<16x128xf32>
      %52 = vector.shape_cast %43 : vector<16x128xf32> to vector<1x16x128xf32>
      %cst_21 = arith.constant dense<0.000000e+00> : vector<16x128xf32>
      %53 = vector.multi_reduction <add>, %52, %cst_21 [0] : vector<1x16x128xf32> to vector<16x128xf32>
      %54 = arith.addf %51, %53 : vector<16x128xf32>
      %c0_22 = arith.constant 0 : index
      %c0_23 = arith.constant 0 : index
      %c0_24 = arith.constant 0 : index
      %c0_25 = arith.constant 0 : index
      %55 = vector.load %arg4[%c0_22, %c0_23, %c0_24, %c0_25] : memref<1x4x16x128xf32, #tpu.memory_space<vmem>>, vector<1x1x16x128xf32>
      %56 = vector.shape_cast %55 : vector<1x1x16x128xf32> to vector<16x128xf32>
      %57 = vector.shape_cast %54 : vector<16x128xf32> to vector<1x1x16x128xf32>
      tpu.vector_store %arg4[%c0_22, %c0_23, %c0_24, %c0_25], %57 {strides = array<i32>} : memref<1x4x16x128xf32, #tpu.memory_space<vmem>>, vector<1x1x16x128xf32>,
      %c0_26 = arith.constant 0 : index
      %c1 = arith.constant 1 : index
      %c0_27 = arith.constant 0 : index
      %c0_28 = arith.constant 0 : index
      %58 = vector.load %arg4[%c0_26, %c1, %c0_27, %c0_28] : memref<1x4x16x128xf32, #tpu.memory_space<vmem>>, vector<1x1x16x128xf32>
      %59 = vector.shape_cast %58 : vector<1x1x16x128xf32> to vector<16x128xf32>
      %60 = vector.shape_cast %45 : vector<16x128xf32> to vector<1x16x128xf32>
      %cst_29 = arith.constant dense<0.000000e+00> : vector<16x128xf32>
      %61 = vector.multi_reduction <add>, %60, %cst_29 [0] : vector<1x16x128xf32> to vector<16x128xf32>
      %62 = arith.addf %59, %61 : vector<16x128xf32>
      %c0_30 = arith.constant 0 : index
      %c1_31 = arith.constant 1 : index
      %c0_32 = arith.constant 0 : index
      %c0_33 = arith.constant 0 : index
      %63 = vector.load %arg4[%c0_30, %c1_31, %c0_32, %c0_33] : memref<1x4x16x128xf32, #tpu.memory_space<vmem>>, vector<1x1x16x128xf32>
      %64 = vector.shape_cast %63 : vector<1x1x16x128xf32> to vector<16x128xf32>
      %65 = vector.shape_cast %62 : vector<16x128xf32> to vector<1x1x16x128xf32>
      tpu.vector_store %arg4[%c0_30, %c1_31, %c0_32, %c0_33], %65 {strides = array<i32>} : memref<1x4x16x128xf32, #tpu.memory_space<vmem>>, vector<1x1x16x128xf32>,
      %c0_34 = arith.constant 0 : index
      %c2 = arith.constant 2 : index
      %c0_35 = arith.constant 0 : index
      %c0_36 = arith.constant 0 : index
      %66 = vector.load %arg4[%c0_34, %c2, %c0_35, %c0_36] : memref<1x4x16x128xf32, #tpu.memory_space<vmem>>, vector<1x1x16x128xf32>
      %67 = vector.shape_cast %66 : vector<1x1x16x128xf32> to vector<16x128xf32>
      %68 = vector.shape_cast %47 : vector<16x128xf32> to vector<1x16x128xf32>
      %cst_37 = arith.constant dense<0.000000e+00> : vector<16x128xf32>
      %69 = vector.multi_reduction <add>, %68, %cst_37 [0] : vector<1x16x128xf32> to vector<16x128xf32>
      %70 = arith.addf %67, %69 : vector<16x128xf32>
      %c0_38 = arith.constant 0 : index
      %c2_39 = arith.constant 2 : index
      %c0_40 = arith.constant 0 : index
      %c0_41 = arith.constant 0 : index
      %71 = vector.load %arg4[%c0_38, %c2_39, %c0_40, %c0_41] : memref<1x4x16x128xf32, #tpu.memory_space<vmem>>, vector<1x1x16x128xf32>
      %72 = vector.shape_cast %71 : vector<1x1x16x128xf32> to vector<16x128xf32>
      %73 = vector.shape_cast %70 : vector<16x128xf32> to vector<1x1x16x128xf32>
      tpu.vector_store %arg4[%c0_38, %c2_39, %c0_40, %c0_41], %73 {strides = array<i32>} : memref<1x4x16x128xf32, #tpu.memory_space<vmem>>, vector<1x1x16x128xf32>,
      %c0_42 = arith.constant 0 : index
      %c3 = arith.constant 3 : index
      %c0_43 = arith.constant 0 : index
      %c0_44 = arith.constant 0 : index
      %74 = vector.load %arg4[%c0_42, %c3, %c0_43, %c0_44] : memref<1x4x16x128xf32, #tpu.memory_space<vmem>>, vector<1x1x16x128xf32>
      %75 = vector.shape_cast %74 : vector<1x1x16x128xf32> to vector<16x128xf32>
      %76 = vector.shape_cast %49 : vector<16x128xf32> to vector<1x16x128xf32>
      %cst_45 = arith.constant dense<0.000000e+00> : vector<16x128xf32>
      %77 = vector.multi_reduction <add>, %76, %cst_45 [0] : vector<1x16x128xf32> to vector<16x128xf32>
      %78 = arith.addf %75, %77 : vector<16x128xf32>
      %c0_46 = arith.constant 0 : index
      %c3_47 = arith.constant 3 : index
      %c0_48 = arith.constant 0 : index
      %c0_49 = arith.constant 0 : index
      %79 = vector.load %arg4[%c0_46, %c3_47, %c0_48, %c0_49] : memref<1x4x16x128xf32, #tpu.memory_space<vmem>>, vector<1x1x16x128xf32>
      %80 = vector.shape_cast %79 : vector<1x1x16x128xf32> to vector<16x128xf32>
      %81 = vector.shape_cast %78 : vector<16x128xf32> to vector<1x1x16x128xf32>
      tpu.vector_store %arg4[%c0_46, %c3_47, %c0_48, %c0_49], %81 {strides = array<i32>} : memref<1x4x16x128xf32, #tpu.memory_space<vmem>>, vector<1x1x16x128xf32>,
    } else {
    }
    return
  }
  func.func @transform_0(%arg0: i32, %arg1: i32) -> (i32, i32) {
    %c1_i32 = arith.constant 1 : i32
    %0 = arith.muli %arg0, %c1_i32 : i32
    %1 = arith.addi %0, %arg1 : i32
    %c0_i32 = arith.constant 0 : i32
    %2 = arith.minsi %1, %c0_i32 : i32
    %c0_i32_0 = arith.constant 0 : i32
    %c0_i32_1 = arith.constant 0 : i32
    return %2, %c0_i32_0 : i32, i32
  }
  func.func @transform_1(%arg0: i32, %arg1: i32) -> (i32, i32) {
    %c1_i32 = arith.constant 1 : i32
    %0 = arith.muli %arg0, %c1_i32 : i32
    %1 = arith.addi %0, %arg1 : i32
    %c0_i32 = arith.constant 0 : i32
    %2 = arith.minsi %1, %c0_i32 : i32
    %c0_i32_0 = arith.constant 0 : i32
    %c0_i32_1 = arith.constant 0 : i32
    return %2, %c0_i32_0 : i32, i32
  }
  func.func @transform_2(%arg0: i32, %arg1: i32) -> (i32, i32, i32, i32) {
    %c0_i32 = arith.constant 0 : i32
    %c0_i32_0 = arith.constant 0 : i32
    %c0_i32_1 = arith.constant 0 : i32
    %c0_i32_2 = arith.constant 0 : i32
    return %arg0, %c0_i32, %c0_i32_0, %c0_i32_1 : i32, i32, i32, i32
  }
}

</mosaic_0001>

<bundles_post_ra>
// kernel: neloss.1
= control target key start
LH: loop header
LB: loop body
LE: loop exit
PB: predicated region body
PF: predicated region fallthrough
CT: control target
= control target key end

     0   :  { %s580_s9 = smov 0   ;;  %s582_s10 = smov 0   ;;  %s692_s0 = inlined_call_operand.vmem [shape: f32[16,128], index: 0, kind: input, shape index: {}]   ;;  %s693_s1 = inlined_call_operand.vmem [shape: f32[16,128], index: 1, kind: input, shape index: {}]   ;;  %s694_s2 = inlined_call_operand.vmem [shape: f32[2,4,16,128], index: 2, kind: output, shape index: {}]  }
   0x1   :  { %s584_s11 = smov 0  }
   0x2 LB: > { %s24_s12 = sadd.s32 1, %s558_s10  ;;  %p466_p0 = scmp.ge.s32.totalorder %s562_s11, 1  ;;  %s562_s11 = sphi %s584_s11, %s12_s11   ;;  %s558_s10 = sphi %s582_s10, %s696_s10   ;;  %s554_s9 = sphi %s580_s9, %s695_s9  }
   0x3   : > { %p26_p1 = scmp.ge.s32.totalorder %s24_s12, 2  ;;  %p160_p2 = scmp.lt.s32.totalorder %s562_s11, 3 }
   0x5   : > { %s698_s12 = smov (%p26_p1, %s24_s12), 0  ;;  %p161_p3 = pnand %p466_p0, %p160_p2 }
   0x6   : > { %p194_p4 = scmp.lt.s32.totalorder (!%p161_p3), %s554_s9, 0  ;;  %p217_p5 = scmp.lt.s32.totalorder (!%p161_p3), %s554_s9, 1 }
   0x7   : > { %164 = sbr.rel (%p161_p3) target bundleno = 95 (0x5f), region = 28  ;;  %s473_s13 = sshll.u32 (!%p161_p3), %s554_s9, 11 }
   0x8   : > { %s607_s17 = sadd.s32 (!%p161_p3), 2048, %s473_s13 }
   0x9   : > { %p474_p7 = scmp.gt.s32.totalorder (!%p161_p3), %s607_s17, 2048 }
   0xc   : > { %s195_s14 = scalar_select %p194_p4, %s554_s9, 0  ;;  %v564_v0 = vmov 0.0  }
   0xd   : > { %s218_s15 = scalar_select %p217_p5, %s554_s9, 1 }
   0xe   : > { %s467_s16 = sshll.u32 %s195_s14, 1 }
   0xf   : > { %p197_p6 = scmp.lt.s32.totalorder %s467_s16, 1  ;;  %s502_s18 = sshll.u32 %s218_s15, 6 }
  0x10   : > { %s612_s21 = scalar_lea.vmem %s694_s2, %s502_s18 }
  0x11   : > { %s700_s16 = smov (!%p197_p6, %s467_s16), 1  ;;  %226 = vst [vmem:[%s612_s21] sm:$0xff] %v564_v0  ;;  %227 = vst [vmem:[%s612_s21 + $0x8] sm:$0xff] %v564_v0 }
  0x12   : > { %228 = vst [vmem:[%s612_s21 + $0x10] sm:$0xff] %v564_v0  ;;  %229 = vst [vmem:[%s612_s21 + $0x18] sm:$0xff] %v564_v0  ;;  %s468_s22 = sshll.u32 %s700_s16, 3 }
  0x13   : > { %230 = vst [vmem:[%s612_s21 + $0x20] sm:$0xff] %v564_v0  ;;  %231 = vst [vmem:[%s612_s21 + $0x28] sm:$0xff] %v564_v0  ;;  %s200_s25 = scalar_lea.vmem %s692_s0, %s468_s22  ;;  %s212_s28 = scalar_lea.vmem %s693_s1, %s468_s22 }
  0x14   : > { %232 = vst [vmem:[%s612_s21 + $0x30] sm:$0xff] %v564_v0  ;;  %233 = vst [vmem:[%s612_s21 + $0x38] sm:$0xff] %v564_v0  ;;  %v234_v1 = vld [vmem:[%s200_s25] sm:$0xff]  ;;  %v235_v2 = vld [vmem:[%s200_s25 + $0x8] sm:$0xff] }
  0x15   : > { %v238_v3 = vand.u32 2147483647, %v234_v1  ;;  %v239_v4 = vand.u32 2147483647, %v235_v2  ;;  %v631_v15 = vld [vmem:[%s212_s28] sm:$0xff]  ;;  %v633_v16 = vld [vmem:[%s212_s28 + $0x8] sm:$0xff] }
  0x16   : > { %v246_v18 = vmax.f32 %v234_v1, 0.0  ;;  %v248_v19 = vmul.f32 %v631_v15, %v234_v1  ;;  %v247_v22 = vmax.f32 %v235_v2, 0.0  ;;  %v249_v23 = vmul.f32 %v633_v16, %v235_v2 }
  0x17   : > { %v240_v5 = vsub.f32 0.0, %v238_v3  ;;  %v241_v6 = vsub.f32 0.0, %v239_v4  ;;  %vm272_vm0 = vcmp.ge.f32.partialorder %v234_v1, 0.0  ;;  %vm273_vm1 = vcmp.ge.f32.partialorder %v235_v2, 0.0 }
  0x18   : > { %v250_v27 = vsub.f32 %v246_v18, %v248_v19  ;;  %v251_v31 = vsub.f32 %v247_v22, %v249_v23 }
  0x19   : > { %v242_v7 = vmul.f32 1.442695, %v240_v5  ;;  %v244_v8 = vmul.f32 1.442695, %v241_v6 }
  0x1b   : > { %528 = vpow2.f32 %v242_v7 }
  0x1c   : > { %530 = vpow2.f32 %v244_v8 }
  0x28   : > { %v529_v9 = vpop.eup %528 }
  0x29   : > { %v531_v10 = vpop.eup %530  ;;  %v252_v11 = vadd.f32 1.0, %v529_v9  ;;  %v255_v13 = vmul.f32 -0.5, %v529_v9  ;;  %v258_v20 = vand.u32 2147483647, %v529_v9  ;;  %v274_v29 = vsel %vm272_vm0, 1.0, %v529_v9 }
  0x2a   : > { %v261_v12 = vadd.f32 1.0, %v531_v10  ;;  %v264_v14 = vmul.f32 -0.5, %v531_v10  ;;  %v267_v24 = vand.u32 2147483647, %v531_v10  ;;  %v275_v33 = vsel %vm273_vm1, 1.0, %v531_v10 }
  0x2b   : > { %532 = vlog2.f32 %v252_v11  ;;  %v256_v17 = vadd.f32 1.0, %v255_v13  ;;  %vm259_vm2 = vcmp.lt.f32.partialorder %v258_v20, 0.0004427343 }
  0x2c   : > { %534 = vlog2.f32 %v261_v12  ;;  %v265_v21 = vadd.f32 1.0, %v264_v14  ;;  %vm268_vm3 = vcmp.lt.f32.partialorder %v267_v24, 0.0004427343 }
  0x2d   : > { %536 = vrcp.f32 %v252_v11  ;;  %v257_v25 = vmul.f32 %v529_v9, %v256_v17 }
  0x2e   : > { %538 = vrcp.f32 %v261_v12  ;;  %v266_v28 = vmul.f32 %v531_v10, %v265_v21 }
  0x38   : > { %v533_v26 = vpop.eup %532 }
  0x39   : > { %v535_v30 = vpop.eup %534  ;;  %v254_v32 = vmul.f32 0.6931472, %v533_v26 }
  0x3a   : > { %v537_v34 = vpop.eup %536  ;;  %v263_v35 = vmul.f32 0.6931472, %v535_v30  ;;  %291 = sbr.rel (%p474_p7) target bundleno = 70 (0x46), region = 36 }
  0x3b   : > { %v539_v36 = vpop.eup %538  ;;  %v260_v37 = vsel %vm259_vm2, %v257_v25, %v254_v32  ;;  %v279_v38 = vmul.f32 %v537_v34, %v274_v29 }
  0x3c   : > { %v269_v39 = vsel %vm268_vm3, %v266_v28, %v263_v35  ;;  %v270_v40 = vadd.f32 %v260_v37, %v250_v27  ;;  %v281_v41 = vmul.f32 %v539_v36, %v275_v33 }
  0x3d   : > { %v271_v42 = vadd.f32 %v269_v39, %v251_v31  ;;  %v282_v43 = vmul.f32 %v279_v38, %v631_v15 }
  0x3e   : > { %v639_v44 = vmul.f32 %v281_v41, %v633_v16 }
  0x3f   : > { %v292_v45 = vld [vmem:[%s612_s21] sm:$0xff]  ;;  %v293_v46 = vld [vmem:[%s612_s21 + $0x8] sm:$0xff]  ;;  %v475_v47 = vld [vmem:[%s612_s21 + $0x10] sm:$0xff] }
  0x40   : > { %v296_v48 = vadd.f32 %v292_v45, %v270_v40  ;;  %v297_v49 = vadd.f32 %v293_v46, %v271_v42  ;;  %v305_v50 = vadd.f32 %v475_v47, %v279_v38  ;;  %v476_v51 = vld [vmem:[%s612_s21 + $0x18] sm:$0xff]  ;;  %v479_v52 = vld [vmem:[%s612_s21 + $0x20] sm:$0xff]  ;;  %v480_v53 = vld [vmem:[%s612_s21 + $0x28] sm:$0xff] }
  0x41   : > { %v306_v54 = vadd.f32 %v476_v51, %v281_v41  ;;  %v314_v55 = vadd.f32 %v479_v52, %v631_v15  ;;  %v315_v56 = vadd.f32 %v480_v53, %v633_v16  ;;  %v483_v57 = vld [vmem:[%s612_s21 + $0x30] sm:$0xff]  ;;  %v484_v58 = vld [vmem:[%s612_s21 + $0x38] sm:$0xff] }
  0x42   : > { %298 = vst [vmem:[%s612_s21] sm:$0xff] %v296_v48  ;;  %299 = vst [vmem:[%s612_s21 + $0x8] sm:$0xff] %v297_v49  ;;  %v323_v59 = vadd.f32 %v483_v57, %v282_v43  ;;  %v324_v60 = vadd.f32 %v484_v58, %v639_v44 }
  0x43   : > { %477 = vst [vmem:[%s612_s21 + $0x10] sm:$0xff] %v305_v50  ;;  %478 = vst [vmem:[%s612_s21 + $0x18] sm:$0xff] %v306_v54 }
  0x44   : > { %481 = vst [vmem:[%s612_s21 + $0x20] sm:$0xff] %v314_v55  ;;  %482 = vst [vmem:[%s612_s21 + $0x28] sm:$0xff] %v315_v56 }
  0x45   : > { %485 = vst [vmem:[%s612_s21 + $0x30] sm:$0xff] %v323_v59  ;;  %486 = vst [vmem:[%s612_s21 + $0x38] sm:$0xff] %v324_v60 }
  0x46 PF: > { %p487_p8 = scmp.le.s32.totalorder %s607_s17, 2048 }
  0x48   : > { %329 = sbr.rel (%p487_p8) target bundleno = 95 (0x5f), region = 40 }
  0x4d   : > { %v330_v61 = vlaneseq  ;;  %v337_v63 = vstv %s473_s13  ;;  %v352_v7 = vld [vmem:[%s612_s21] sm:$0xff]  ;;  %v488_v8 = vld [vmem:[%s612_s21 + $0x10] sm:$0xff]  ;;  %v353_v11 = vld [vmem:[%s612_s21 + $0x8] sm:$0xff] }
  0x4e   : > { %v492_v9 = vld [vmem:[%s612_s21 + $0x20] sm:$0xff]  ;;  %v496_v12 = vld [vmem:[%s612_s21 + $0x30] sm:$0xff]  ;;  %v489_v17 = vld [vmem:[%s612_s21 + $0x18] sm:$0xff] }
  0x4f   : > { %v331_v62 = vshrl.u32 %v330_v61, 7  ;;  %v334_v0 = vand.u32 127, %v330_v61  ;;  %v493_v19 = vld [vmem:[%s612_s21 + $0x28] sm:$0xff]  ;;  %v497_v24 = vld [vmem:[%s612_s21 + $0x38] sm:$0xff] }
  0x51   : > { %v335_v1 = vmul.u32 128, %v331_v62  ;;  %v332_v2 = vadd.s32 8, %v331_v62 }
  0x53   : > { %v338_v3 = vadd.s32 %v337_v63, %v335_v1  ;;  %v336_v4 = vmul.u32 128, %v332_v2 }
  0x55   : > { %v340_v5 = vadd.s32 %v338_v3, %v334_v0  ;;  %v339_v6 = vadd.s32 %v337_v63, %v336_v4 }
  0x57   : > { %vm342_vm4 = vcmp.lt.s32.totalorder %v340_v5, 2048  ;;  %v341_v10 = vadd.s32 %v339_v6, %v334_v0 }
  0x58   : > { %v344_v13 = vsel %vm342_vm4, %v270_v40, 0.0  ;;  %v346_v14 = vsel %vm342_vm4, %v279_v38, 0.0  ;;  %v348_v18 = vsel %vm342_vm4, %v631_v15, 0.0  ;;  %v350_v20 = vsel %vm342_vm4, %v282_v43, 0.0 }
  0x59   : > { %v356_v21 = vadd.f32 %v352_v7, %v344_v13  ;;  %vm343_vm5 = vcmp.lt.s32.totalorder %v341_v10, 2048  ;;  %v365_v22 = vadd.f32 %v488_v8, %v346_v14  ;;  %v374_v23 = vadd.f32 %v492_v9, %v348_v18 }
  0x5a   : > { %v345_v25 = vsel %vm343_vm5, %v271_v42, 0.0  ;;  %v347_v26 = vsel %vm343_vm5, %v281_v41, 0.0  ;;  %v349_v27 = vsel %vm343_vm5, %v633_v16, 0.0  ;;  %v383_v28 = vadd.f32 %v496_v12, %v350_v20 }
  0x5b   : > { %358 = vst [vmem:[%s612_s21] sm:$0xff] %v356_v21  ;;  %v357_v15 = vadd.f32 %v353_v11, %v345_v25  ;;  %490 = vst [vmem:[%s612_s21 + $0x10] sm:$0xff] %v365_v22  ;;  %v366_v29 = vadd.f32 %v489_v17, %v347_v26  ;;  %v375_v30 = vadd.f32 %v493_v19, %v349_v27  ;;  %v351_v31 = vsel %vm343_vm5, %v639_v44, 0.0 }
  0x5c   : > { %494 = vst [vmem:[%s612_s21 + $0x20] sm:$0xff] %v374_v23  ;;  %498 = vst [vmem:[%s612_s21 + $0x30] sm:$0xff] %v383_v28  ;;  %v384_v32 = vadd.f32 %v497_v24, %v351_v31 }
  0x5d   : > { %359 = vst [vmem:[%s612_s21 + $0x8] sm:$0xff] %v357_v15  ;;  %491 = vst [vmem:[%s612_s21 + $0x18] sm:$0xff] %v366_v29 }
  0x5e   : > { %495 = vst [vmem:[%s612_s21 + $0x28] sm:$0xff] %v375_v30  ;;  %499 = vst [vmem:[%s612_s21 + $0x38] sm:$0xff] %v384_v32 }
  0x5f PF: > { %s12_s11 = sadd.s32 1, %s562_s11   ;;  %s695_s9 = smov %s558_s10 }
  0x60   : > { %p9_p9 = scmp.ge.s32.totalorder %s12_s11, 4   ;;  %s696_s10 = smov %s698_s12 }
  0x62   :  { %11 = sbr.rel (!%p9_p9) target bundleno = 2 (0x2), region = 79 }

</bundles_post_ra>
